<compile_context>
chip_gen: v7x
topology: tpu7x:2x2x1
jax: 0.10.0
libtpu: 0.0.40
codegen_flags: <defaults>
</compile_context>

<pallas_src>
import numpy as np
import jax
import jax.numpy as jnp
from jax.experimental import pallas as pl
from jax.experimental.pallas import tpu as pltpu


# Slab layout (rows x 128 lanes, f32). Every weight extent is 8-row aligned and
# zero-padded so all kernel slices are whole (8, *) tiles.
#   rows   0:8     w1_h   (6->8  rows, 25->32 cols)  layer-1 weight, hidden rows
#   rows   8:24    w1_aux (9->16 rows, 25->32 cols)  layer-1 weight, [params, pm_material]
#   rows  24:56    w2     (25->32 rows, 25->32 cols)
#   rows  56:88    w3     (25->32 rows, 50->64 cols)
#   rows  88:152   w_out  (50->64 rows, 1 col)
#   row  152       b_eff  (6, padded to 8)   composed backbone+linear1+bn1 bias
#   row  153       b1     (25, padded to 32)
#   row  154       b2     (25, padded to 32)
#   row  155       b3     (50, padded to 64)
#   row  156       b_out  (1)
SLAB_ROWS = 160
SLAB_COLS = 128
AUX_PAD = 16      # cat(parameters, pm_material) = 9 features, padded to 16 lanes
H_PAD = 8         # hidden_dim_init = 6, padded to 8


# ----------------------------------------------------------------------------
# Pallas kernel: entire forward hot path in one invocation (per batch block).
# ----------------------------------------------------------------------------
def regression_torque_kernel(img_ref, aux_ref, weff_ref, slab_ref, y_ref):
    relu = lambda v: jnp.maximum(v, 0.0)
    dot = lambda a, b: jnp.dot(a, b, preferred_element_type=jnp.float32)

    # biases (BN already folded in)
    b_eff = slab_ref[152:153, 0:H_PAD]
    b1 = slab_ref[153:154, 0:32]
    b2 = slab_ref[154:155, 0:32]
    b3 = slab_ref[155:156, 0:64]
    bo = slab_ref[156:157, 0:1]

    # Backbone stand-in composed with linear1 + bn1 (eval), then ReLU -> (B, 8).
    # w_eff is stored lane-dense as (8, f_in); contract both last dims so the
    # sublane-padded (f_in, 8) layout never exists in HBM or VMEM.
    h = relu(
        jax.lax.dot_general(
            img_ref[...], weff_ref[...],
            dimension_numbers=(((1,), (1,)), ((), ())),
            preferred_element_type=jnp.float32,
        )
        + b_eff
    )

    aux = aux_ref[...]  # (B, 16) = [current(2), pm_temp(1), pm_material(6), 0...]

    # layer 1: cat([h, parameters, pm_material]) @ W1  (2-way K-split: h + aux)
    x = relu(dot(h, slab_ref[0:8, 0:32]) + dot(aux, slab_ref[8:24, 0:32]) + b1)
    # layers 2, 3 (BN + bias folded; zero-padded to aligned tile extents)
    x = relu(dot(x, slab_ref[24:56, 0:32]) + b2)
    x = relu(dot(x, slab_ref[56:88, 0:64]) + b3)
    # output head
    y_ref[...] = dot(x, slab_ref[88:152, 0:1]) + bo


# ----------------------------------------------------------------------------
# Wrapper: flatten image, concat+pad scalar side-inputs, pass prepped params.
# Small batches -> gridless single call. Large batches -> grid over batch with
# "parallel" semantics (uses both TensorCores on v7x).
# ----------------------------------------------------------------------------
def regression_torque_forward(image, parameters, pm_material, weff_T, slab,
                              batch_block=None):
    B = image.shape[0]
    f_in = weff_T.shape[1]
    img_flat = image.reshape(B, -1).astype(jnp.float32)
    aux9 = jnp.concatenate([parameters, pm_material], axis=1).astype(jnp.float32)
    aux = jnp.zeros((B, AUX_PAD), jnp.float32).at[:, : aux9.shape[1]].set(aux9)

    # Advisory cost so XLA overlaps surrounding HLO with this tiny custom call.
    flops = 2 * B * (f_in * H_PAD + H_PAD * 32 + AUX_PAD * 32 + 32 * 32 + 32 * 64 + 64)
    bytes_accessed = 4 * (B * f_in + B * AUX_PAD + H_PAD * f_in
                          + SLAB_ROWS * SLAB_COLS + B)
    cost = pl.CostEstimate(flops=flops, transcendentals=0,
                           bytes_accessed=bytes_accessed)

    out_shape = jax.ShapeDtypeStruct((B, 1), jnp.float32)

    if batch_block is not None and B > batch_block and B % batch_block == 0:
        bb = batch_block
        return pl.pallas_call(
            regression_torque_kernel,
            out_shape=out_shape,
            grid=(B // bb,),
            in_specs=[
                pl.BlockSpec((bb, f_in), lambda i: (i, 0)),
                pl.BlockSpec((bb, AUX_PAD), lambda i: (i, 0)),
                pl.BlockSpec((H_PAD, f_in), lambda i: (0, 0)),
                pl.BlockSpec((SLAB_ROWS, SLAB_COLS), lambda i: (0, 0)),
            ],
            out_specs=pl.BlockSpec((bb, 1), lambda i: (i, 0)),
            compiler_params=pltpu.CompilerParams(
                dimension_semantics=("parallel",)),
            cost_estimate=cost,
        )(img_flat, aux, weff_T, slab)

    # Gridless path for small B: everything fits VMEM trivially; a grid or
    # extra buffering would only add per-step overhead.
    vmem = pl.BlockSpec(memory_space=pltpu.MemorySpace.VMEM)
    return pl.pallas_call(
        regression_torque_kernel,
        out_shape=out_shape,
        in_specs=[vmem, vmem, vmem, vmem],
        out_specs=vmem,
        cost_estimate=cost,
    )(img_flat, aux, weff_T, slab)


# ----------------------------------------------------------------------------
# Deterministic parameter construction (shapes from RegressionTorque.__init__).
# ----------------------------------------------------------------------------
def init_params(key, f_in, num_ftrs=1000, hidden_dim_init=6,
                current_dim=2, pm_temp_dim=1, pm_material_dim=6,
                num_hidden_dims=3, hidden_dim_other=25, hidden_dim_out=50,
                output_dim1=1):
    kit = iter(jax.random.split(key, 64))

    def lin(din, dout):
        w = jax.random.normal(next(kit), (din, dout), jnp.float32) / np.sqrt(din)
        b = 0.01 * jax.random.normal(next(kit), (1, dout), jnp.float32)
        return w, b

    def bn(d, eps=1e-5):  # eval-mode BN folded to per-feature scale/shift
        gamma = 1.0 + 0.1 * jax.random.normal(next(kit), (1, d), jnp.float32)
        beta = 0.1 * jax.random.normal(next(kit), (1, d), jnp.float32)
        mean = 0.1 * jax.random.normal(next(kit), (1, d), jnp.float32)
        var = 0.5 + jax.random.uniform(next(kit), (1, d), dtype=jnp.float32)
        scale = gamma / jnp.sqrt(var + eps)
        shift = beta - mean * scale
        return scale, shift

    P = {}
    P['wb'], P['bb'] = lin(f_in, num_ftrs)              # swin_t backbone stand-in
    P['w1'], P['b1'] = lin(num_ftrs, hidden_dim_init)   # linear1
    P['s1'], P['t1'] = bn(hidden_dim_init)              # bn1 (eval mode)

    hidden_dims = [hidden_dim_other] * num_hidden_dims
    hidden_dims[-1] = hidden_dim_out                     # [25, 25, 50]
    cat_dim = hidden_dim_init + current_dim + pm_material_dim + pm_temp_dim  # 15

    layers, d = [], cat_dim
    for hd in hidden_dims:
        w, b = lin(d, hd)
        s, t = bn(hd)
        layers.append((w, b, s, t))
        d = hd
    P['layers'] = layers
    P['wo'], P['bo'] = lin(d, output_dim1)               # out1
    return P


# ----------------------------------------------------------------------------
# Parameter folding / packing (all off the hot path).
# ----------------------------------------------------------------------------
def fold_params(P):
    f_in = P['wb'].shape[0]
    # compose backbone stand-in with linear1 and bn1 (eval)
    w_eff = (P['wb'] @ P['w1']) * P['s1']                       # (f_in, 6)
    b_eff = (P['bb'] @ P['w1'] + P['b1']) * P['s1'] + P['t1']   # (1, 6)

    def fold(w, b, s, t):   # Linear + eval-BN  ->  single affine
        return w * s, b * s + t

    w1f, b1f = fold(*P['layers'][0])   # (15, 25)
    w2f, b2f = fold(*P['layers'][1])   # (25, 25)
    w3f, b3f = fold(*P['layers'][2])   # (25, 50)
    wo, bo = P['wo'], P['bo']          # (50, 1), (1, 1)

    # lane-dense, 8-sublane-padded transpose of the composed backbone weight
    weff_T = np.zeros((H_PAD, f_in), np.float32)
    weff_T[0:6, :] = np.asarray(w_eff).T

    slab = np.zeros((SLAB_ROWS, SLAB_COLS), np.float32)
    slab[0:6,    0:25] = np.asarray(w1f[0:6])     # hidden-feature rows
    slab[8:17,   0:25] = np.asarray(w1f[6:15])    # [parameters, pm_material] rows
    slab[24:49,  0:25] = np.asarray(w2f)
    slab[56:81,  0:50] = np.asarray(w3f)
    slab[88:138, 0:1]  = np.asarray(wo)
    slab[152, 0:6]  = np.asarray(b_eff)[0]
    slab[153, 0:25] = np.asarray(b1f)[0]
    slab[154, 0:25] = np.asarray(b2f)[0]
    slab[155, 0:50] = np.asarray(b3f)[0]
    slab[156, 0:1]  = np.asarray(bo)[0]
    return jnp.asarray(weff_T), jnp.asarray(slab)


# ----------------------------------------------------------------------------
# Pure-JAX reference (mirrors the PyTorch forward, unfolded, explicit concat).
# ----------------------------------------------------------------------------
def reference_forward(image, parameters, pm_material, P):
    B = image.shape[0]
    relu = lambda v: jnp.maximum(v, 0.0)
    x = image.reshape(B, -1) @ P['wb'] + P['bb']     # backbone stand-in
    x = x @ P['w1'] + P['b1']                        # linear1
    x = relu(x * P['s1'] + P['t1'])                  # bn1 (eval) + ReLU
    x = jnp.concatenate([x, parameters], axis=1)
    x = jnp.concatenate([x, pm_material], axis=1)
    for (w, b, s, t) in P['layers']:
        x = relu((x @ w + b) * s + t)
    return x @ P['wo'] + P['bo']


if __name__ == "__main__":
    key = jax.random.PRNGKey(0)
    k_img, k_par, k_pmm, k_p, k_big = jax.random.split(key, 5)

    B, C, H, W = 2, 4, 16, 16
    image = jax.random.normal(k_img, (B, C, H, W), jnp.float32)   # NCHW
    parameters = jax.random.normal(k_par, (B, 3), jnp.float32)    # current(2)+pm_temp(1)
    pm_material = jax.random.normal(k_pmm, (B, 6), jnp.float32)   # material encoding

    P = init_params(k_p, C * H * W)
    weff_T, slab = fold_params(P)

    # --- small-batch (gridless) path, B=2 ---
    y1 = regression_torque_forward(image, parameters, pm_material, weff_T, slab)
    jax.block_until_ready(y1)
    ref = reference_forward(image, parameters, pm_material, P)
    assert y1.shape == (B, 1)
    # tolerance accounts for the FP-reassociation of the backbone/linear1 fold
    np.testing.assert_allclose(np.asarray(y1), np.asarray(ref), rtol=1e-3, atol=1e-3)

    # --- batched path: grid over batch, "parallel" -> both TCs on v7x ---
    Bb = 256
    kb1, kb2, kb3 = jax.random.split(k_big, 3)
    image_b = jax.random.normal(kb1, (Bb, C, H, W), jnp.float32)
    parameters_b = jax.random.normal(kb2, (Bb, 3), jnp.float32)
    pm_material_b = jax.random.normal(kb3, (Bb, 6), jnp.float32)
    y1_b = regression_torque_forward(image_b, parameters_b, pm_material_b,
                                     weff_T, slab, batch_block=128)
    jax.block_until_ready(y1_b)
    ref_b = reference_forward(image_b, parameters_b, pm_material_b, P)
    assert y1_b.shape == (Bb, 1)
    np.testing.assert_allclose(np.asarray(y1_b), np.asarray(ref_b),
                               rtol=1e-3, atol=1e-3)

    print("KERNEL_OK")
</pallas_src>

<mosaic_0001>
module attributes {stable_mosaic.version = 11 : i64} {
  func.func @regression_torque_kernel(%arg0: memref<2x1024xf32, #tpu.memory_space<vmem>>, %arg1: memref<2x16xf32, #tpu.memory_space<vmem>>, %arg2: memref<8x1024xf32, #tpu.memory_space<vmem>>, %arg3: memref<160x128xf32, #tpu.memory_space<vmem>>, %arg4: memref<2x1xf32, #tpu.memory_space<vmem>>) attributes {dimension_semantics = [], scalar_prefetch = 0 : i64, scratch_operands = 0 : i64, tpu.core_type = #tpu.core_type<tc>} {
    %c152 = arith.constant 152 : index
    %c0 = arith.constant 0 : index
    %0 = vector.load %arg3[%c152, %c0] : memref<160x128xf32, #tpu.memory_space<vmem>>, vector<1x8xf32>
    %c153 = arith.constant 153 : index
    %c0_0 = arith.constant 0 : index
    %1 = vector.load %arg3[%c153, %c0_0] : memref<160x128xf32, #tpu.memory_space<vmem>>, vector<1x32xf32>
    %c154 = arith.constant 154 : index
    %c0_1 = arith.constant 0 : index
    %2 = vector.load %arg3[%c154, %c0_1] : memref<160x128xf32, #tpu.memory_space<vmem>>, vector<1x32xf32>
    %c155 = arith.constant 155 : index
    %c0_2 = arith.constant 0 : index
    %3 = vector.load %arg3[%c155, %c0_2] : memref<160x128xf32, #tpu.memory_space<vmem>>, vector<1x64xf32>
    %c156 = arith.constant 156 : index
    %c0_3 = arith.constant 0 : index
    %4 = vector.load %arg3[%c156, %c0_3] : memref<160x128xf32, #tpu.memory_space<vmem>>, vector<1x1xf32>
    %c0_4 = arith.constant 0 : index
    %c0_5 = arith.constant 0 : index
    %5 = vector.load %arg0[%c0_4, %c0_5] : memref<2x1024xf32, #tpu.memory_space<vmem>>, vector<2x1024xf32>
    %c0_6 = arith.constant 0 : index
    %c0_7 = arith.constant 0 : index
    %6 = vector.load %arg2[%c0_6, %c0_7] : memref<8x1024xf32, #tpu.memory_space<vmem>>, vector<8x1024xf32>
    %cst = arith.constant dense<0.000000e+00> : vector<2x8xf32>
    %7 = tpu.matmul %5, %6, %cst {dimension_numbers = #tpu.dot_dimension_numbers<[1], [1], [0], [0], [0, 0, 1, 0], [], []>} : vector<2x1024xf32>, vector<8x1024xf32>, vector<2x8xf32> -> vector<2x8xf32>
    %8 = vector.broadcast %0 : vector<1x8xf32> to vector<2x8xf32>
    %9 = arith.addf %7, %8 : vector<2x8xf32>
    %cst_8 = arith.constant 0.000000e+00 : f32
    %10 = vector.broadcast %cst_8 : f32 to vector<2x8xf32>
    %11 = arith.maximumf %9, %10 : vector<2x8xf32>
    %c0_9 = arith.constant 0 : index
    %c0_10 = arith.constant 0 : index
    %12 = vector.load %arg1[%c0_9, %c0_10] : memref<2x16xf32, #tpu.memory_space<vmem>>, vector<2x16xf32>
    %c0_11 = arith.constant 0 : index
    %c0_12 = arith.constant 0 : index
    %13 = vector.load %arg3[%c0_11, %c0_12] : memref<160x128xf32, #tpu.memory_space<vmem>>, vector<8x32xf32>
    %cst_13 = arith.constant dense<0.000000e+00> : vector<2x32xf32>
    %14 = tpu.matmul %11, %13, %cst_13 {dimension_numbers = #tpu.dot_dimension_numbers<[1], [0], [0], [1], [0, 0, 1, 1], [], []>} : vector<2x8xf32>, vector<8x32xf32>, vector<2x32xf32> -> vector<2x32xf32>
    %c8 = arith.constant 8 : index
    %c0_14 = arith.constant 0 : index
    %15 = vector.load %arg3[%c8, %c0_14] : memref<160x128xf32, #tpu.memory_space<vmem>>, vector<16x32xf32>
    %cst_15 = arith.constant dense<0.000000e+00> : vector<2x32xf32>
    %16 = tpu.matmul %12, %15, %cst_15 {dimension_numbers = #tpu.dot_dimension_numbers<[1], [0], [0], [1], [0, 0, 1, 1], [], []>} : vector<2x16xf32>, vector<16x32xf32>, vector<2x32xf32> -> vector<2x32xf32>
    %17 = arith.addf %14, %16 : vector<2x32xf32>
    %18 = vector.broadcast %1 : vector<1x32xf32> to vector<2x32xf32>
    %19 = arith.addf %17, %18 : vector<2x32xf32>
    %cst_16 = arith.constant 0.000000e+00 : f32
    %20 = vector.broadcast %cst_16 : f32 to vector<2x32xf32>
    %21 = arith.maximumf %19, %20 : vector<2x32xf32>
    %c24 = arith.constant 24 : index
    %c0_17 = arith.constant 0 : index
    %22 = vector.load %arg3[%c24, %c0_17] : memref<160x128xf32, #tpu.memory_space<vmem>>, vector<32x32xf32>
    %cst_18 = arith.constant dense<0.000000e+00> : vector<2x32xf32>
    %23 = tpu.matmul %21, %22, %cst_18 {dimension_numbers = #tpu.dot_dimension_numbers<[1], [0], [0], [1], [0, 0, 1, 1], [], []>} : vector<2x32xf32>, vector<32x32xf32>, vector<2x32xf32> -> vector<2x32xf32>
    %24 = vector.broadcast %2 : vector<1x32xf32> to vector<2x32xf32>
    %25 = arith.addf %23, %24 : vector<2x32xf32>
    %cst_19 = arith.constant 0.000000e+00 : f32
    %26 = vector.broadcast %cst_19 : f32 to vector<2x32xf32>
    %27 = arith.maximumf %25, %26 : vector<2x32xf32>
    %c56 = arith.constant 56 : index
    %c0_20 = arith.constant 0 : index
    %28 = vector.load %arg3[%c56, %c0_20] : memref<160x128xf32, #tpu.memory_space<vmem>>, vector<32x64xf32>
    %cst_21 = arith.constant dense<0.000000e+00> : vector<2x64xf32>
    %29 = tpu.matmul %27, %28, %cst_21 {dimension_numbers = #tpu.dot_dimension_numbers<[1], [0], [0], [1], [0, 0, 1, 1], [], []>} : vector<2x32xf32>, vector<32x64xf32>, vector<2x64xf32> -> vector<2x64xf32>
    %30 = vector.broadcast %3 : vector<1x64xf32> to vector<2x64xf32>
    %31 = arith.addf %29, %30 : vector<2x64xf32>
    %cst_22 = arith.constant 0.000000e+00 : f32
    %32 = vector.broadcast %cst_22 : f32 to vector<2x64xf32>
    %33 = arith.maximumf %31, %32 : vector<2x64xf32>
    %c88 = arith.constant 88 : index
    %c0_23 = arith.constant 0 : index
    %34 = vector.load %arg3[%c88, %c0_23] : memref<160x128xf32, #tpu.memory_space<vmem>>, vector<64x1xf32>
    %cst_24 = arith.constant dense<0.000000e+00> : vector<2x1xf32>
    %35 = tpu.matmul %33, %34, %cst_24 {dimension_numbers = #tpu.dot_dimension_numbers<[1], [0], [0], [1], [0, 0, 1, 1], [], []>} : vector<2x64xf32>, vector<64x1xf32>, vector<2x1xf32> -> vector<2x1xf32>
    %36 = vector.broadcast %4 : vector<1x1xf32> to vector<2x1xf32>
    %37 = arith.addf %35, %36 : vector<2x1xf32>
    %c0_25 = arith.constant 0 : index
    %c0_26 = arith.constant 0 : index
    %38 = vector.load %arg4[%c0_25, %c0_26] : memref<2x1xf32, #tpu.memory_space<vmem>>, vector<2x1xf32>
    tpu.vector_store %arg4[%c0_25, %c0_26], %37 {strides = array<i32>} : memref<2x1xf32, #tpu.memory_space<vmem>>, vector<2x1xf32>,
    return
  }
}

</mosaic_0001>

<bundles_post_ra>
// kernel: tpu_custom_call.1
= control target key start
LH: loop header
LB: loop body
LE: loop exit
PB: predicated region body
PF: predicated region fallthrough
CT: control target
= control target key end

     0   :  { %9 = vsyncpa [#allocation3], 0  ;;  %s1109_s0 = inlined_call_operand.hbm [shape: f32[2,1024], index: 0, kind: input, shape index: {}]   ;;  %s1110_s1 = inlined_call_operand.vmem [shape: f32[2,16], index: 1, kind: input, shape index: {}]   ;;  %s1111_s2 = inlined_call_operand.hbm [shape: f32[8,1024], index: 2, kind: input, shape index: {}]   ;;  %s1112_s3 = inlined_call_operand.hbm [shape: f32[160,128], index: 3, kind: input, shape index: {}]   ;;  %s1113_s4 = inlined_call_operand.vmem [shape: f32[2,1], index: 4, kind: output, shape index: {}]  }
   0x1   :  { %10 = vsyncpa [#allocation5], 0  ;;  %s1017_s15 = smov [#allocation4]   ;;  %s1018_s17 = smov [#allocation2]  }
   0x2   :  { %s29_s16 = sshll.u32 %s1017_s15, 4  ;;  %s17_s18 = sshll.u32 %s1018_s17, 4  ;;  %s30_s16 = int_to_ptr.vmem [resolvable:$true] %s29_s16  ;;  %s18_s18 = int_to_ptr.vmem [resolvable:$true] %s17_s18 }
   0x3   :  { %s947_s21 = scalar_lea.hbm %s1111_s2, 1024 }
   0x4   :  { %p948_p0 = scmp.ne.s32.totalorder %s1111_s2, %s947_s21  ;;  %p951_p1 = scmp.lt.u32.totalorder %s947_s21, %s1111_s2 }
   0x6   :  { %p953_p2 = pnand %p951_p1, %p948_p0 }
   0x8   :  { %956 = shalt.err (!%p953_p2)
}
   0x9   :  { %s957_s26 = scalar_lea.vmem %s30_s16, 1024  ;;  %p962_p4 = scmp.lt.s32.totalorder %s30_s16, %s30_s16 }
   0xa   :  { %p958_p3 = scmp.ne.s32.totalorder %s30_s16, %s957_s26  ;;  %p963_p5 = scmp.lt.s32.totalorder %s957_s26, %s957_s26 }
   0xc   :  { %p964_p6 = por %p963_p5, %p962_p4 }
   0xe   :  { %p965_p7 = pnand %p964_p6, %p958_p3 }
  0x10   :  { %968 = shalt.err (!%p965_p7)
}
  0x11   :  { %32 = dma.hbm_to_vmem [thread:$0]  %s1111_s2, 1024, %s30_s16, [#allocation5]  }
  0x12   :  { %s969_s5 = scalar_lea.hbm %s1109_s0, 256 }
  0x13   :  { %p970_p8 = scmp.ne.s32.totalorder %s1109_s0, %s969_s5  ;;  %p973_p9 = scmp.lt.u32.totalorder %s969_s5, %s1109_s0 }
  0x15   :  { %p975_p10 = pnand %p973_p9, %p970_p8 }
  0x17   :  { %978 = shalt.err (!%p975_p10)
}
  0x18   :  { %s979_s10 = scalar_lea.vmem %s18_s18, 256  ;;  %p984_p12 = scmp.lt.s32.totalorder %s18_s18, %s18_s18 }
  0x19   :  { %p980_p11 = scmp.ne.s32.totalorder %s18_s18, %s979_s10  ;;  %p985_p13 = scmp.lt.s32.totalorder %s979_s10, %s979_s10 }
  0x1b   :  { %p986_p0 = por %p985_p13, %p984_p12 }
  0x1d   :  { %p987_p1 = pnand %p986_p0, %p980_p11 }
  0x1f   :  { %990 = shalt.err (!%p987_p1)
}
  0x20   :  { %20 = dma.hbm_to_vmem [thread:$0]  %s1109_s0, 256, %s18_s18, [#allocation3]  }
  0x21   :  { %s1019_s12 = smov [#allocation6]   ;;  %s991_s16 = scalar_lea.hbm %s1112_s3, 2560 }
  0x22   :  { %s38_s13 = sshll.u32 %s1019_s12, 4  ;;  %p992_p2 = scmp.ne.s32.totalorder %s1112_s3, %s991_s16  ;;  %s39_s13 = int_to_ptr.vmem [resolvable:$true] %s38_s13 }
  0x23   :  { %p995_p3 = scmp.lt.u32.totalorder %s991_s16, %s1112_s3 }
  0x25   :  { %p997_p4 = pnand %p995_p3, %p992_p2 }
  0x27   :  { %1000 = shalt.err (!%p997_p4)
}
  0x28   :  { %s1001_s22 = scalar_lea.vmem %s39_s13, 2560  ;;  %p1006_p6 = scmp.lt.s32.totalorder %s39_s13, %s39_s13 }
  0x29   :  { %p1002_p5 = scmp.ne.s32.totalorder %s39_s13, %s1001_s22  ;;  %p1007_p7 = scmp.lt.s32.totalorder %s1001_s22, %s1001_s22 }
  0x2b   :  { %p1008_p8 = por %p1007_p7, %p1006_p6 }
  0x2d   :  { %p1009_p9 = pnand %p1008_p8, %p1002_p5 }
  0x2f   :  { %1012 = shalt.err (!%p1009_p9)
}
  0x30   :  { %s1020_s0 = smov 128   ;;  %s1021_s18 = smov 8  }
  0x31   :  { %44 = dma.hbm_to_vmem [thread:$0]  %s1112_s3, 2560, %s39_s13, [#allocation5], %s1020_s0, %s1020_s0, %s1021_s18  }
  0x32   :  { %1013 = dma.done.wait [#allocation3], 256  }
  0x33   :  { %1014 = vsyncadd [#allocation3], 4294967040 }
  0x34   :  { %1015 = dma.done.wait [#allocation5], 3584  }
  0x35   :  { %1016 = vsyncadd [#allocation5], 4294963712  ;;  %v79_v0 = vlaneseq  ;;  %v1022_v1 = vmov 1983009808   ;;  %v62_v6 = vld [vmem:[#allocation4 + $0x8] sm:$0xff]  ;;  %v61_v7 = vld [vmem:[#allocation4] sm:$0xff] }
  0x36   :  { %v77_v2 = vunpack.c.l.s4 %v1022_v1  ;;  %v59_v8 = vld [vmem:[#allocation2] sm:$0xff]  ;;  %117 = vmatprep.subr.mxu0 %v62_v6  ;;  %v64_v11 = vld [vmem:[#allocation4 + $0x18] sm:$0xff]  ;;  %v66_v17 = vld [vmem:[#allocation4 + $0x28] sm:$0xff]  ;;  %v1023_v29 = vmov 0.0|0.0   ;;  %vm1024_vm0 = vmmov 0   ;;  %v1025_v30 = vmov 0.0  }
  0x37   :  { %v80_v3 = vshrl.u32 %v79_v0, 7  ;;  %v75_v9 = vcombine.high %v59_v8, %v59_v8  ;;  %118 = vmatpush1.xpose.msra.mxu0 %v61_v7  ;;  %v63_v14 = vld [vmem:[#allocation4 + $0x10] sm:$0xff]  ;;  %v60_v15 = vld [vmem:[#allocation2 + $0x8] sm:$0xff]  ;;  %v65_v21 = vld [vmem:[#allocation4 + $0x20] sm:$0xff]  ;;  %856 = vmatprep.subr.mxu1 %v1025_v30  ;;  %vm402_vm1 = vcmask 130048   ;;  %vm476_vm2 = vcmask 64512  }
  0x38   :  { %v78_v4 = vunpack.c.0.s8 %v77_v2  ;;  %187 = vmatprep.subr.mxu0 %v64_v11  ;;  %v92_v20 = vcombine.high %v60_v15, %v60_v15  ;;  %v68_v22 = vld [vmem:[#allocation4 + $0x38] sm:$0xff]  ;;  %v67_v25 = vld [vmem:[#allocation4 + $0x30] sm:$0xff]  ;;  %v400_v26 = vld [vmem:[#allocation6 + $0x8] sm:$0xff]  ;;  %858 = vmatprep.mubr.msk.f32.mxu1 %vm1024_vm0, %v1025_v30  ;;  %vm564_vm3 = vcmask 261120   ;;  %vm733_vm4 = vcmask 523264  }
  0x39   :  { %v401_v27 = vld [vmem:[#allocation6 + $0x10] sm:$0xff]  ;;  %v399_v32 = vld [vmem:[#allocation6] sm:$0xff]  ;;  %v815_v33 = vld [vmem:[#allocation6 + $0x98] ss:$0 sm:$0xff]  ;;  %vm807_vm5 = vcmask 1024  }
  0x3a   :  { %v81_v5 = vsub.s32 %v78_v4, %v80_v3  ;;  %v903_v28 = vpack.c.bf16 %v401_v27, %v400_v26  ;;  %v398_v31 = vld [vmem:[%s1110_s1] sm:$0x3]  ;;  %857 = vmatpush3.msra.mxu1 %v399_v32  ;;  %v556_v38 = vld [vmem:[#allocation6 + $0x18] sm:$0xff]  ;;  %v557_v39 = vld [vmem:[#allocation6 + $0x20] sm:$0xff] }
  0x3b   :  { %905 = vmatprep.subr.bf16.mxu1 %v1023_v29  ;;  %v906_v40 = vpack.c.bf16 %v557_v39, %v556_v38  ;;  %v558_v43 = vld [vmem:[#allocation6 + $0x28] sm:$0xff]  ;;  %v559_v44 = vld [vmem:[#allocation6 + $0x30] sm:$0xff]  ;;  %v639_v46 = vld [vmem:[#allocation6 + $0x38] sm:$0xff] }
  0x3c   :  { %v82_v10 = vrot.slane %v59_v8, %v81_v5  ;;  %v89_v13 = vrot.slane %v75_v9, %v81_v5  ;;  %v99_v18 = vrot.slane %v60_v15, %v81_v5  ;;  %v106_v23 = vrot.slane %v92_v20, %v81_v5  ;;  %v640_v47 = vld [vmem:[#allocation6 + $0x40] sm:$0xff]  ;;  %v818_v49 = vld [vmem:[#allocation6 + $0x99] ss:$0 sm:$0xff]  ;;  %v641_v55 = vld [vmem:[#allocation6 + $0x48] sm:$0xff] }
  0x3d   :  { %v909_v45 = vpack.c.bf16 %v559_v44, %v558_v43  ;;  %v912_v48 = vpack.c.bf16 %v640_v47, %v639_v46  ;;  %v642_v56 = vld [vmem:[#allocation6 + $0x50] sm:$0xff]  ;;  %v721_v58 = vld [vmem:[#allocation6 + $0x58] sm:$0xff]  ;;  %v722_v59 = vld [vmem:[#allocation6 + $0x60] sm:$0xff] }
  0x3e   :  { %v90_v12 = vcombine.high %v82_v10, %v82_v10  ;;  %v91_v16 = vcombine.high %v89_v13, %v89_v13  ;;  %v107_v19 = vcombine.high %v99_v18, %v99_v18  ;;  %v108_v24 = vcombine.high %v106_v23, %v106_v23  ;;  %v723_v60 = vld [vmem:[#allocation6 + $0x68] sm:$0xff]  ;;  %v724_v62 = vld [vmem:[#allocation6 + $0x70] sm:$0xff]  ;;  %v725_v0 = vld [vmem:[#allocation6 + $0x78] sm:$0xff] }
  0x3f   :  { %v915_v57 = vpack.c.bf16 %v642_v56, %v641_v55  ;;  %v918_v61 = vpack.c.bf16 %v722_v59, %v721_v58  ;;  %v921_v63 = vpack.c.bf16 %v724_v62, %v723_v60  ;;  %v726_v1 = vld [vmem:[#allocation6 + $0x80] sm:$0xff]  ;;  %v819_v3 = vld [vmem:[#allocation6 + $0x9a] ss:$0 sm:$0xff]  ;;  %v727_v8 = vld [vmem:[#allocation6 + $0x88] sm:$0xff] }
  0x40   :  { %181 = vmatprep.mubr.f32.mxu0 %v90_v12  ;;  %v924_v2 = vpack.c.bf16 %v726_v1, %v725_v0  ;;  %v728_v9 = vld [vmem:[#allocation6 + $0x90] sm:$0xff]  ;;  %v821_v11 = vld [vmem:[#allocation6 + $0x9b] ss:$0 sm:$0xff] }
  0x41   :  { %182 = vmatmul.mubr.f32.vlgmr.msra.gmra.mrb[0].mxu0 %v82_v10  ;;  %v927_v10 = vpack.c.bf16 %v728_v9, %v727_v8 }
  0x42   :  { %188 = vmatpush1.xpose.msra.mxu0 %v63_v14  ;;  %251 = vmatprep.mubr.f32.mxu0 %v91_v16  ;;  %v823_v16 = vld [vmem:[#allocation6 + $0x9c] ss:$0 sm:$0xff] }
  0x43   :  { %257 = vmatprep.subr.mxu0 %v66_v17 }
  0x49   :  { %252 = vmatmul.mubr.f32.vlgmr.msra.gmra.mrb[0].mxu0 %v89_v13 }
  0x4a   :  { %258 = vmatpush1.xpose.msra.mxu0 %v65_v21  ;;  %321 = vmatprep.mubr.f32.mxu0 %v107_v19 }
  0x4b   :  { %327 = vmatprep.subr.mxu0 %v68_v22 }
  0x51   :  { %322 = vmatmul.mubr.f32.vlgmr.msra.gmra.mrb[0].mxu0 %v99_v18 }
  0x52   :  { %328 = vmatpush1.xpose.msra.mxu0 %v67_v25  ;;  %391 = vmatprep.mubr.f32.mxu0 %v108_v24 }
  0x53   :  { %902 = vmatprep.subr.bf16.mxu0 %v1023_v29 }
  0x59   :  { %392 = vmatmul.mubr.f32.vlgmr.msra.gmra.mrb[0].mxu0 %v106_v23 }
  0x5a   :  { %904 = vmatpush3.bf16.msra.mxu0 %v903_v28  ;;  %853 = vmatprep.mubr.msk.f32.mxu0 %vm1024_vm0, %v1025_v30 }
  0x5b   :  { %911 = vmatprep.subr.bf16.mxu0 %v1023_v29 }
  0x5d   :  { %854 = vmatmul.mubr.msk.f32.vlgmr.msra.gmra.mrb[2].mxu0 %vm402_vm1, %v398_v31 }
  0x5e   :  { %880 = vmatprep.mubr.msk.f32.mxu0 %vm1024_vm0, %v1025_v30  ;;  %913 = vmatpush3.bf16.msra.mxu0 %v912_v48 }
  0x5f   :  { %914 = vmatprep.subr.bf16.mxu0 %v1023_v29 }
  0x62   :  { %916 = vmatpush3.bf16.msra.mxu0 %v915_v57 }
 0x12c   :  { %v393_v34 = vpop.f32.mrb[0].mxu0 }
 0x12d   :  { %v929_v35 = vadd.f32 %v815_v33, %v393_v34  ;;  %v395_v36 = vpop.f32.mrb[1].mxu0 }
 0x12f   :  { %v397_v37 = vmax.f32 %v929_v35, 0.0 }
 0x130   :  { %v472_v41 = vpop.f32.mrb[2].mxu0 }
 0x131   :  { %859 = vmatmul.mubr.msk.f32.vlgmr.msra.gmra.mrb[0].mxu1 %vm476_vm2, %v397_v37  ;;  %v855_v42 = vpop.f32.mrb[3].mxu0 }
 0x132   :  { %869 = vmatprep.mubr.msk.f32.mxu1 %vm1024_vm0, %v1025_v30  ;;  %907 = vmatpush3.bf16.msra.mxu1 %v906_v40 }
 0x133   :  { %908 = vmatprep.subr.bf16.mxu1 %v1023_v29 }
 0x136   :  { %910 = vmatpush3.bf16.msra.mxu1 %v909_v45 }
 0x137   :  { %917 = vmatprep.subr.bf16.mxu1 %v1023_v29 }
 0x204   :  { %v546_v50 = vpop.f32.mrb[0].mxu1 }
 0x205   :  { %v547_v51 = vadd.f32 %v546_v50, %v472_v41  ;;  %v860_v52 = vpop.f32.mrb[1].mxu1 }
 0x207   :  { %v554_v53 = vadd.f32 %v818_v49, %v547_v51 }
 0x209   :  { %v555_v54 = vmax.f32 %v554_v53, 0.0 }
 0x20b   :  { %870 = vmatmul.mubr.msk.f32.vlgmr.msra.gmra.mrb[2].mxu1 %vm564_vm3, %v555_v54 }
 0x20c   :  { %899 = vmatprep.mubr.msk.f32.mxu1 %vm1024_vm0, %v1025_v30  ;;  %919 = vmatpush3.bf16.msra.mxu1 %v918_v61 }
 0x20d   :  { %920 = vmatprep.subr.bf16.mxu1 %v1023_v29 }
 0x210   :  { %922 = vmatpush3.bf16.msra.mxu1 %v921_v63 }
 0x211   :  { %923 = vmatprep.subr.bf16.mxu1 %v1023_v29 }
 0x214   :  { %925 = vmatpush3.bf16.msra.mxu1 %v924_v2 }
 0x215   :  { %926 = vmatprep.subr.bf16.mxu1 %v1023_v29 }
 0x218   :  { %928 = vmatpush3.bf16.msra.mxu1 %v927_v10 }
 0x2de   :  { %v634_v4 = vpop.f32.mrb[2].mxu1 }
 0x2df   :  { %v635_v5 = vadd.f32 %v819_v3, %v634_v4  ;;  %v871_v6 = vpop.f32.mrb[3].mxu1 }
 0x2e1   :  { %v638_v7 = vmax.f32 %v635_v5, 0.0 }
 0x2e3   :  { %881 = vmatmul.mubr.msk.f32.vlgmr.msra.gmra.mrb[4].mxu0 %vm564_vm3, %v638_v7 }
 0x3b6   :  { %v716_v12 = vpop.f32.mrb[4].mxu0 }
 0x3b7   :  { %v717_v13 = vadd.f32 %v821_v11, %v716_v12  ;;  %v882_v14 = vpop.f32.mrb[5].mxu0 }
 0x3b9   :  { %v720_v15 = vmax.f32 %v717_v13, 0.0 }
 0x3bb   :  { %900 = vmatmul.mubr.msk.f32.vlgmr.msra.gmra.mrb[4].mxu1 %vm733_vm4, %v720_v15 }
 0x48e   :  { %v803_v17 = vpop.f32.mrb[4].mxu1 }
 0x48f   :  { %v804_v18 = vadd.f32 %v823_v16, %v803_v17  ;;  %v901_v19 = vpop.f32.mrb[5].mxu1 }
 0x491   :  { %808 = vst.msk [vmem:[%s1113_s4] sm:$0x3] %vm807_vm5, %v804_v18 }
 0x492   :  { %813 = vsyncpa [#allocation3], 1 }
 0x493   :  { %814 = vsyncpa [#allocation5], 1 }

</bundles_post_ra>
